<compile_context>
chip_gen: v7x
topology: tpu7x:2x2x1
jax: 0.10.0
libtpu: 0.0.40
codegen_flags: <defaults>
</compile_context>

<pallas_src>
import functools

import jax
import jax.numpy as jnp
from jax.experimental import pallas as pl
from jax.experimental.pallas import tpu as pltpu

_LANE = 128
_SUBLANE = 8
_NEG_SLOPE = 0.01              # torch nn.LeakyReLU() default
_VMEM_BUDGET = 24 * 1024 * 1024  # keep well under the 32 MiB scoped limit
_VMEM_LIMIT = 32 * 1024 * 1024   # explicit scoped limit (default on v6e/v7x)


def _round_up(a, b):
    return (a + b - 1) // b * b


def _vmem_tile_bytes(shape, dtype):
    """Conservative VMEM footprint of one 2-D block (sublane/lane padded)."""
    r, c = shape
    return (_round_up(max(int(r), 1), 16) * _round_up(max(int(c), 1), _LANE)
            * jnp.dtype(dtype).itemsize)


# ---------------------------------------------------------------------------
# Fused MLP kernel:  h = LeakyReLU(...LeakyReLU(x@W0+b0)...)@W_last + b_last
# ---------------------------------------------------------------------------
def _fused_mlp_kernel(x_ref, *refs, n_layers: int, negative_slope: float,
                      compute_dtype):
    o_ref = refs[-1]
    p_refs = refs[:-1]            # w0, b0, w1, b1, ..., w_{L-1}, b_{L-1}
    h = x_ref[...]                # [tile_m, K0] (input dtype)
    for i in range(n_layers):
        w = p_refs[2 * i][...]            # [K_i, N_i] (pre-transposed, bf16)
        b = p_refs[2 * i + 1][...]        # [1,  N_i]  (f32)
        acc = jnp.dot(h.astype(compute_dtype), w,
                      preferred_element_type=jnp.float32) + b
        if i != n_layers - 1:
            acc = jnp.maximum(acc, negative_slope * acc)   # LeakyReLU(0.01)
        h = acc                                            # f32
    out_w = o_ref.shape[-1]
    o_ref[...] = h[:, :out_w].astype(o_ref.dtype)


def fused_mlp_forward(x, params_t, out_w, *, negative_slope=_NEG_SLOPE,
                      compute_dtype=jnp.bfloat16, max_tile_m=2048):
    """x: [M, K0].  params_t: list of (w_t [K_i, N_i], b [1, N_i]).

    The final layer's (w_t, b) are zero-padded along the out axis to a multiple
    of 128 (MXU-friendly); only `out_w` columns are written back to HBM and the
    caller slices out the real latent_dim columns.
    """
    M, K0 = x.shape
    n_layers = len(params_t)

    # --- VMEM budget: weights/biases are resident (double-buffered by the
    # --- pipeline), x/out blocks are double-buffered per grid step.
    w_bytes = 0
    for w_t, b in params_t:
        w_bytes += 2 * (_vmem_tile_bytes(w_t.shape, w_t.dtype)
                        + _vmem_tile_bytes(b.shape, b.dtype))
    per_row = 2 * (_round_up(K0, _LANE) * jnp.dtype(x.dtype).itemsize
                   + _round_up(out_w, _LANE) * 4)
    avail = _VMEM_BUDGET - w_bytes - (2 << 20)
    cap_rows = max(_SUBLANE, (max(avail, 0) // per_row) // _SUBLANE * _SUBLANE)
    # TODO(synk): for extremely large flat_in even tile_m=8 may exceed VMEM;
    # that needs K-tiling of the first matmul, out of scope here.

    # --- Batch tiling: big tiles amortize the ~0.35us per-step overhead, but
    # --- keep >=2 grid steps for M>=16 so both v7x TensorCores get work.
    if M >= 16:
        tile_m = min(max_tile_m, cap_rows, _round_up(pl.cdiv(M, 2), _SUBLANE))
    else:
        tile_m = _SUBLANE
    tile_m = max(tile_m, _SUBLANE)
    grid_m = pl.cdiv(M, tile_m)        # ragged edge handled by partial block

    in_specs = [pl.BlockSpec((tile_m, K0), lambda i: (i, 0))]
    flat_params = []
    for (w_t, b) in params_t:
        k, n = w_t.shape
        in_specs.append(pl.BlockSpec((k, n), lambda i: (0, 0)))   # full weight
        in_specs.append(pl.BlockSpec((1, n), lambda i: (0, 0)))   # bias row
        flat_params += [w_t, b]

    kernel = functools.partial(_fused_mlp_kernel, n_layers=n_layers,
                               negative_slope=negative_slope,
                               compute_dtype=compute_dtype)
    out = pl.pallas_call(
        kernel,
        out_shape=jax.ShapeDtypeStruct((M, out_w), jnp.float32),
        grid=(grid_m,),
        in_specs=in_specs,
        out_specs=pl.BlockSpec((tile_m, out_w), lambda i: (i, 0)),
        compiler_params=pltpu.CompilerParams(
            dimension_semantics=("parallel",),
            vmem_limit_bytes=_VMEM_LIMIT),
    )(x, *flat_params)
    return out


# ---------------------------------------------------------------------------
# LISV2_Model (mlp) in JAX
# ---------------------------------------------------------------------------
class LISV2ModelPallas:
    """JAX/Pallas port of LISV2_Model with model_type='mlp'."""

    def __init__(self, input_dim, network_structure, latent_dim=2, seed=0,
                 compute_dtype=jnp.bfloat16):
        # NetworkStructure[0] = prod(input_dim), as in the torch module.
        flat_in = 1
        for d in input_dim:
            flat_in *= d
        ns = list(network_structure)
        ns[0] = flat_in
        self.network_structure = ns
        self.latent_dim = latent_dim
        self.compute_dtype = compute_dtype

        # Deterministic parameter init (torch default Linear init bounds:
        # U(-1/sqrt(fan_in), 1/sqrt(fan_in))), stored in torch layout [out, in]
        # for the pure-JAX reference.
        key = jax.random.PRNGKey(seed)
        self.params = []
        for i in range(len(ns) - 1):
            fan_in, fan_out = ns[i], ns[i + 1]
            key, kw, kb = jax.random.split(key, 3)
            bound = 1.0 / (fan_in ** 0.5)
            w = jax.random.uniform(kw, (fan_out, fan_in), jnp.float32,
                                   -bound, bound)
            b = jax.random.uniform(kb, (fan_out,), jnp.float32, -bound, bound)
            self.params.append((w, b))

        # Kernel-friendly params, prepared ONCE (hoisted out of forward):
        #  - transposed to [in, out] and cast to the streaming/compute dtype
        #  - bias kept in f32, reshaped to [1, out]
        #  - final layer zero-padded along the out axis to a multiple of 128
        #    (MXU-friendly matmul width; padding columns are never stored).
        self.params_t = []
        n_layers = len(self.params)
        for i, (w, b) in enumerate(self.params):
            w_t = jnp.transpose(w).astype(compute_dtype)   # [in, out]
            b_r = b.reshape(1, -1).astype(jnp.float32)     # [1, out]
            if i == n_layers - 1:
                n = w_t.shape[1]
                n_pad = _round_up(n, _LANE)
                if n_pad != n:
                    w_t = jnp.pad(w_t, ((0, 0), (0, n_pad - n)))
                    b_r = jnp.pad(b_r, ((0, 0), (0, n_pad - n)))
            self.params_t.append((w_t, b_r))
        # Narrow output width written back to HBM (>= latent_dim, sublane-ish
        # chunked for the DMA, still ~16x fewer bytes than the 128-wide pad).
        self.out_w = min(_round_up(latent_dim, _SUBLANE),
                         int(self.params_t[-1][0].shape[1]))

    def forward(self, data):
        """data: [batch, flat_in] (or [batch, *input_dim]) -> [batch, latent_dim] f32."""
        x = data.reshape(data.shape[0], -1)
        y = fused_mlp_forward(x, self.params_t, self.out_w,
                              compute_dtype=self.compute_dtype)
        return y[:, :self.latent_dim]


# ---------------------------------------------------------------------------
# Pure-JAX references for correctness checks.
#  - matched=True mirrors the kernel's bf16-operand / f32-accumulate matmuls
#    (tight tolerance, validates kernel structure exactly).
#  - matched=False is the straight f32 torch-semantics reference (loose
#    tolerance appropriate for bf16 operand streaming).
# ---------------------------------------------------------------------------
def reference_forward(model, data, matched=False):
    x = data.reshape(data.shape[0], -1).astype(jnp.float32)
    n_layers = len(model.params)
    for i, (w, b) in enumerate(model.params):
        if matched:
            y = jnp.dot(x.astype(model.compute_dtype),
                        w.T.astype(model.compute_dtype),
                        preferred_element_type=jnp.float32) + b
        else:
            y = x @ w.T + b
        if i != n_layers - 1:
            y = jnp.maximum(y, _NEG_SLOPE * y)
        x = y
    return x


if __name__ == "__main__":
    # Small shapes consistent with the module: input_dim=[1, 8, 8] -> 64 flat,
    # NetworkStructure = [*, 32, 16, latent_dim=2], batch = 8.
    input_dim = [1, 8, 8]
    network_structure = [0, 32, 16, 2]   # [0] gets overwritten with prod(input_dim)
    batch = 8

    model = LISV2ModelPallas(input_dim, network_structure, latent_dim=2, seed=0)

    key = jax.random.PRNGKey(0)
    flat_in = model.network_structure[0]
    x = jax.random.normal(key, (batch, flat_in), jnp.float32)

    out = model.forward(x)
    out = jax.block_until_ready(out)
    assert out.shape == (batch, model.latent_dim)

    # Tight check against a precision-matched reference (same bf16 casts).
    ref_matched = reference_forward(model, x, matched=True)
    assert jnp.allclose(out, ref_matched, atol=1e-4, rtol=1e-4), \
        "mismatch vs precision-matched reference"

    # Sanity check against the pure-f32 torch-semantics reference; tolerance
    # sized for bf16 operand streaming (weights/activations quantized to bf16).
    ref_f32 = reference_forward(model, x, matched=False)
    assert jnp.allclose(out, ref_f32, atol=2e-2, rtol=2e-2), \
        "mismatch vs f32 reference beyond bf16 tolerance"

    # TODO(synk): the 'cnn' branch (resnet18 encoder) and the optional DEC
    # decoder are out of scope here; only the 'mlp' encoder forward is
    # implemented.
    print("KERNEL_OK")
</pallas_src>

<mosaic_0001>
module attributes {stable_mosaic.version = 11 : i64} {
  func.func @_fused_mlp_kernel(%arg0: i32, %arg1: memref<8x64xf32, #tpu.memory_space<vmem>>, %arg2: memref<64x32xbf16, #tpu.memory_space<vmem>>, %arg3: memref<1x32xf32, #tpu.memory_space<vmem>>, %arg4: memref<32x16xbf16, #tpu.memory_space<vmem>>, %arg5: memref<1x16xf32, #tpu.memory_space<vmem>>, %arg6: memref<16x128xbf16, #tpu.memory_space<vmem>>, %arg7: memref<1x128xf32, #tpu.memory_space<vmem>>, %arg8: memref<8x8xf32, #tpu.memory_space<vmem>>) attributes {dimension_semantics = [#tpu.dimension_semantics<parallel>], iteration_bounds = array<i64: 1>, scalar_prefetch = 0 : i64, scratch_operands = 0 : i64, tpu.core_type = #tpu.core_type<tc>, window_params = [{transform_indices = @transform_0, window_bounds = array<i64: 8, 64>}, {pipeline_mode = #tpu.pipeline_mode<synchronous>, transform_indices = @transform_1, window_bounds = array<i64: 64, 32>}, {pipeline_mode = #tpu.pipeline_mode<synchronous>, transform_indices = @transform_2, window_bounds = array<i64: 1, 32>}, {pipeline_mode = #tpu.pipeline_mode<synchronous>, transform_indices = @transform_3, window_bounds = array<i64: 32, 16>}, {pipeline_mode = #tpu.pipeline_mode<synchronous>, transform_indices = @transform_4, window_bounds = array<i64: 1, 16>}, {pipeline_mode = #tpu.pipeline_mode<synchronous>, transform_indices = @transform_5, window_bounds = array<i64: 16, 128>}, {pipeline_mode = #tpu.pipeline_mode<synchronous>, transform_indices = @transform_6, window_bounds = array<i64: 1, 128>}, {transform_indices = @transform_7, window_bounds = array<i64: 8, 8>}]} {
    %c0 = arith.constant 0 : index
    %c0_0 = arith.constant 0 : index
    %0 = vector.load %arg1[%c0, %c0_0] : memref<8x64xf32, #tpu.memory_space<vmem>>, vector<8x64xf32>
    %c0_1 = arith.constant 0 : index
    %c0_2 = arith.constant 0 : index
    %1 = vector.load %arg2[%c0_1, %c0_2] : memref<64x32xbf16, #tpu.memory_space<vmem>>, vector<64x32xbf16>
    %c0_3 = arith.constant 0 : index
    %c0_4 = arith.constant 0 : index
    %2 = vector.load %arg3[%c0_3, %c0_4] : memref<1x32xf32, #tpu.memory_space<vmem>>, vector<1x32xf32>
    %3 = arith.truncf %0 : vector<8x64xf32> to vector<8x64xbf16>
    %cst = arith.constant dense<0.000000e+00> : vector<8x32xf32>
    %4 = tpu.matmul %3, %1, %cst {dimension_numbers = #tpu.dot_dimension_numbers<[1], [0], [0], [1], [0, 0, 1, 1], [], []>} : vector<8x64xbf16>, vector<64x32xbf16>, vector<8x32xf32> -> vector<8x32xf32>
    %5 = vector.broadcast %2 : vector<1x32xf32> to vector<8x32xf32>
    %6 = arith.addf %4, %5 : vector<8x32xf32>
    %cst_5 = arith.constant 0.00999999977 : f32
    %7 = vector.broadcast %cst_5 : f32 to vector<8x32xf32>
    %8 = arith.mulf %7, %6 : vector<8x32xf32>
    %9 = arith.maximumf %6, %8 : vector<8x32xf32>
    %c0_6 = arith.constant 0 : index
    %c0_7 = arith.constant 0 : index
    %10 = vector.load %arg4[%c0_6, %c0_7] : memref<32x16xbf16, #tpu.memory_space<vmem>>, vector<32x16xbf16>
    %c0_8 = arith.constant 0 : index
    %c0_9 = arith.constant 0 : index
    %11 = vector.load %arg5[%c0_8, %c0_9] : memref<1x16xf32, #tpu.memory_space<vmem>>, vector<1x16xf32>
    %12 = arith.truncf %9 : vector<8x32xf32> to vector<8x32xbf16>
    %cst_10 = arith.constant dense<0.000000e+00> : vector<8x16xf32>
    %13 = tpu.matmul %12, %10, %cst_10 {dimension_numbers = #tpu.dot_dimension_numbers<[1], [0], [0], [1], [0, 0, 1, 1], [], []>} : vector<8x32xbf16>, vector<32x16xbf16>, vector<8x16xf32> -> vector<8x16xf32>
    %14 = vector.broadcast %11 : vector<1x16xf32> to vector<8x16xf32>
    %15 = arith.addf %13, %14 : vector<8x16xf32>
    %cst_11 = arith.constant 0.00999999977 : f32
    %16 = vector.broadcast %cst_11 : f32 to vector<8x16xf32>
    %17 = arith.mulf %16, %15 : vector<8x16xf32>
    %18 = arith.maximumf %15, %17 : vector<8x16xf32>
    %c0_12 = arith.constant 0 : index
    %c0_13 = arith.constant 0 : index
    %19 = vector.load %arg6[%c0_12, %c0_13] : memref<16x128xbf16, #tpu.memory_space<vmem>>, vector<16x128xbf16>
    %c0_14 = arith.constant 0 : index
    %c0_15 = arith.constant 0 : index
    %20 = vector.load %arg7[%c0_14, %c0_15] : memref<1x128xf32, #tpu.memory_space<vmem>>, vector<1x128xf32>
    %21 = arith.truncf %18 : vector<8x16xf32> to vector<8x16xbf16>
    %cst_16 = arith.constant dense<0.000000e+00> : vector<8x128xf32>
    %22 = tpu.matmul %21, %19, %cst_16 {dimension_numbers = #tpu.dot_dimension_numbers<[1], [0], [0], [1], [0, 0, 1, 1], [], []>} : vector<8x16xbf16>, vector<16x128xbf16>, vector<8x128xf32> -> vector<8x128xf32>
    %23 = vector.broadcast %20 : vector<1x128xf32> to vector<8x128xf32>
    %24 = arith.addf %22, %23 : vector<8x128xf32>
    %25 = vector.extract_strided_slice %24 {offsets = [0, 0], sizes = [8, 8], strides = [1, 1]} : vector<8x128xf32> to vector<8x8xf32>
    %c0_17 = arith.constant 0 : index
    %c0_18 = arith.constant 0 : index
    %26 = vector.load %arg8[%c0_17, %c0_18] : memref<8x8xf32, #tpu.memory_space<vmem>>, vector<8x8xf32>
    tpu.vector_store %arg8[%c0_17, %c0_18], %25 {strides = array<i32>} : memref<8x8xf32, #tpu.memory_space<vmem>>, vector<8x8xf32>,
    return
  }
  func.func @transform_0(%arg0: i32) -> (i32, i32) {
    %c0_i32 = arith.constant 0 : i32
    %c0_i32_0 = arith.constant 0 : i32
    return %arg0, %c0_i32 : i32, i32
  }
  func.func @transform_1(%arg0: i32) -> (i32, i32) {
    %c0_i32 = arith.constant 0 : i32
    %c0_i32_0 = arith.constant 0 : i32
    %c0_i32_1 = arith.constant 0 : i32
    return %c0_i32, %c0_i32_0 : i32, i32
  }
  func.func @transform_2(%arg0: i32) -> (i32, i32) {
    %c0_i32 = arith.constant 0 : i32
    %c0_i32_0 = arith.constant 0 : i32
    %c0_i32_1 = arith.constant 0 : i32
    return %c0_i32, %c0_i32_0 : i32, i32
  }
  func.func @transform_3(%arg0: i32) -> (i32, i32) {
    %c0_i32 = arith.constant 0 : i32
    %c0_i32_0 = arith.constant 0 : i32
    %c0_i32_1 = arith.constant 0 : i32
    return %c0_i32, %c0_i32_0 : i32, i32
  }
  func.func @transform_4(%arg0: i32) -> (i32, i32) {
    %c0_i32 = arith.constant 0 : i32
    %c0_i32_0 = arith.constant 0 : i32
    %c0_i32_1 = arith.constant 0 : i32
    return %c0_i32, %c0_i32_0 : i32, i32
  }
  func.func @transform_5(%arg0: i32) -> (i32, i32) {
    %c0_i32 = arith.constant 0 : i32
    %c0_i32_0 = arith.constant 0 : i32
    %c0_i32_1 = arith.constant 0 : i32
    return %c0_i32, %c0_i32_0 : i32, i32
  }
  func.func @transform_6(%arg0: i32) -> (i32, i32) {
    %c0_i32 = arith.constant 0 : i32
    %c0_i32_0 = arith.constant 0 : i32
    %c0_i32_1 = arith.constant 0 : i32
    return %c0_i32, %c0_i32_0 : i32, i32
  }
  func.func @transform_7(%arg0: i32) -> (i32, i32) {
    %c0_i32 = arith.constant 0 : i32
    %c0_i32_0 = arith.constant 0 : i32
    return %arg0, %c0_i32 : i32, i32
  }
}

</mosaic_0001>

<bundles_post_ra>
// kernel: tpu_custom_call.1
= control target key start
LH: loop header
LB: loop body
LE: loop exit
PB: predicated region body
PF: predicated region fallthrough
CT: control target
= control target key end

     0   :  { %v344_v1 = vmov 0.0   ;;  %vm345_vm0 = vmmov 0   ;;  %s435_s0 = inlined_call_operand.vmem [shape: f32[8,64], index: 0, kind: input, shape index: {}]   ;;  %s436_s1 = inlined_call_operand.vmem [shape: bf16[64,32], index: 1, kind: input, shape index: {}]   ;;  %s437_s2 = inlined_call_operand.vmem [shape: f32[1,32], index: 2, kind: input, shape index: {}]   ;;  %s438_s3 = inlined_call_operand.vmem [shape: bf16[32,16], index: 3, kind: input, shape index: {}]   ;;  %s439_s4 = inlined_call_operand.vmem [shape: f32[1,16], index: 4, kind: input, shape index: {}]   ;;  %s440_s5 = inlined_call_operand.vmem [shape: bf16[16,128], index: 5, kind: input, shape index: {}]   ;;  %s441_s6 = inlined_call_operand.vmem [shape: f32[1,128], index: 6, kind: input, shape index: {}]   ;;  %s442_s7 = inlined_call_operand.hbm [shape: f32[8,8], index: 7, kind: output, shape index: {}]  }
   0x1   :  { %v313_v0 = vld [vmem:[%s436_s1] sm:$0xff]   ;;  %284 = vmatprep.subr.bf16.mxu0 %v344_v1  ;;  %296 = vmatprep.subr.bf16.mxu1 %v344_v1  ;;  %v314_v2 = vld [vmem:[%s436_s1 + $0x8] sm:$0xff]   ;;  %v315_v3 = vld [vmem:[%s436_s1 + $0x10] sm:$0xff]  }
   0x2   :  { %285 = vmatpush3.bf16.msra.mxu0 %v313_v0  ;;  %292 = vmatprep.mubr.msk.bf16.mxu0 %vm345_vm0, %v344_v1 }
   0x3   :  { %286 = vmatprep.subr.bf16.mxu0 %v344_v1  ;;  %300 = vmatprep.mubr.msk.bf16.mxu1 %vm345_vm0, %v344_v1 }
   0x6   :  { %287 = vmatpush3.bf16.msra.mxu0 %v314_v2 }
   0x7   :  { %12 = vsyncpa [#allocation3], 0  ;;  %288 = vmatprep.subr.bf16.mxu0 %v344_v1  ;;  %v316_v4 = vld [vmem:[%s436_s1 + $0x18] sm:$0xff]   ;;  %v28_v5 = vld [vmem:[%s435_s0] sm:$0xff]  ;;  %vm69_vm1 = vcmask 523264   ;;  %vm139_vm2 = vcmask 261120  }
   0x8   :  { %v38_v6 = vpack.c.bf16 %v28_v5, %v28_v5  ;;  %v317_v7 = vld [vmem:[%s438_s3] sm:$0xff]   ;;  %v318_v8 = vld [vmem:[%s438_s3 + $0x8] sm:$0xff]   ;;  %vm201_vm3 = vcmask 130048   ;;  %vm245_vm4 = vcmask 64512  }
   0x9   :  { %297 = vmatpush3.bf16.msra.mxu1 %v317_v7  ;;  %v261_v9 = vld [vmem:[%s437_s2] ss:$0 sm:$0xff] }
   0xa   :  { %289 = vmatpush3.bf16.msra.mxu0 %v315_v3  ;;  %298 = vmatprep.subr.bf16.mxu1 %v344_v1  ;;  %v319_v18 = vld [vmem:[%s440_s5] sm:$0xff]   ;;  %s346_s5 = smov [#allocation2]  }
   0xb   :  { %290 = vmatprep.subr.bf16.mxu0 %v344_v1  ;;  %v267_v19 = vld [vmem:[%s439_s4] ss:$0 sm:$0xff]  ;;  %s253_s19 = sshll.u32 %s346_s5, 4  ;;  %s254_s19 = int_to_ptr.vmem [resolvable:$true] %s253_s19 }
   0xc   :  { %v271_v28 = vld [vmem:[%s441_s6] ss:$0 sm:$0xff]  ;;  %s320_s4 = scalar_lea.vmem %s254_s19, 128  ;;  %p325_p1 = scmp.lt.s32.totalorder %s254_s19, %s254_s19 }
   0xd   :  { %299 = vmatpush3.bf16.msra.mxu1 %v318_v8  ;;  %p321_p0 = scmp.ne.s32.totalorder %s254_s19, %s320_s4  ;;  %p326_p2 = scmp.lt.s32.totalorder %s320_s4, %s320_s4 }
   0xe   :  { %291 = vmatpush3.bf16.msra.mxu0 %v316_v4  ;;  %304 = vmatprep.subr.bf16.mxu1 %v344_v1 }
   0xf   :  { %p327_p3 = por %p326_p2, %p325_p1 }
  0x11   :  { %293 = vmatmul.mubr.msk.bf16.vlgmr.msra.gmra.mrb[0].mxu0 %vm69_vm1, %v38_v6  ;;  %p328_p4 = pnand %p327_p3, %p321_p0 }
  0xe4   :  { %v107_v10 = vpop.f32.mrb[0].mxu0 }
  0xe5   :  { %v108_v11 = vadd.f32 %v261_v9, %v107_v10  ;;  %v294_v12 = vpop.f32.mrb[1].mxu0 }
  0xe6   :  { %v110_v13 = vpop.f32.mrb[2].mxu0 }
  0xe7   :  { %v113_v14 = vmul.f32 0.01, %v108_v11  ;;  %v295_v15 = vpop.f32.mrb[3].mxu0 }
  0xe9   :  { %v114_v16 = vmax.f32 %v108_v11, %v113_v14 }
  0xeb   :  { %v120_v17 = vpack.c.bf16 %v114_v16, %v114_v16 }
  0xed   :  { %301 = vmatmul.mubr.msk.bf16.vlgmr.msra.gmra.mrb[0].mxu1 %vm139_vm2, %v120_v17 }
  0xee   :  { %306 = vmatprep.mubr.msk.bf16.mxu1 %vm345_vm0, %v344_v1  ;;  %305 = vmatpush3.bf16.msra.mxu1 %v319_v18 }
 0x1c0   :  { %v177_v20 = vpop.f32.mrb[0].mxu1 }
 0x1c1   :  { %v178_v21 = vadd.f32 %v267_v19, %v177_v20  ;;  %v302_v22 = vpop.f32.mrb[1].mxu1 }
 0x1c2   :  { %v180_v23 = vpop.f32.mrb[2].mxu1 }
 0x1c3   :  { %v183_v24 = vmul.f32 0.01, %v178_v21  ;;  %v303_v25 = vpop.f32.mrb[3].mxu1 }
 0x1c5   :  { %v184_v26 = vmax.f32 %v178_v21, %v183_v24 }
 0x1c7   :  { %v188_v27 = vpack.c.bf16 %v184_v26, %v184_v26 }
 0x1c9   :  { %307 = vmatmul.mubr.msk.bf16.vlgmr.msra.gmra.mrb[4].mxu1 %vm201_vm3, %v188_v27 }
 0x29c   :  { %v239_v29 = vpop.f32.mrb[4].mxu1 }
 0x29d   :  { %v240_v30 = vadd.f32 %v271_v28, %v239_v29  ;;  %v308_v31 = vpop.f32.mrb[5].mxu1 }
 0x29e   :  { %v242_v32 = vpop.f32.mrb[6].mxu1 }
 0x29f   :  { %v309_v33 = vpop.f32.mrb[7].mxu1  ;;  %246 = vst.msk [vmem:[#allocation2] sm:$0xff] %vm245_vm4, %v240_v30 }
 0x2a0   :  { %331 = shalt.err (!%p328_p4)
}
 0x2a1   :  { %s332_s6 = scalar_lea.hbm %s442_s7, 128 }
 0x2a2   :  { %p333_p5 = scmp.ne.s32.totalorder %s442_s7, %s332_s6  ;;  %p336_p6 = scmp.lt.u32.totalorder %s332_s6, %s442_s7 }
 0x2a4   :  { %p338_p7 = pnand %p336_p6, %p333_p5 }
 0x2a6   :  { %341 = shalt.err (!%p338_p7)
}
 0x2a7   :  { %256 = dma.vmem_to_hbm [thread:$0]  %s254_s19, 128, %s442_s7, [#allocation3]  }
 0x2a8   :  { %342 = dma.done.wait [#allocation3], 128  }
 0x2a9   :  { %343 = vsyncadd [#allocation3], 4294967168 }
 0x2aa   :  { %260 = vsyncpa [#allocation3], 1 }

</bundles_post_ra>
